<compile_context>
chip_gen: v5e
topology: v5e:2x2
jax: 0.10.0
libtpu: 0.0.40
codegen_flags: <defaults>
</compile_context>

<pallas_src>
import functools
import math

import jax
import jax.numpy as jnp
from jax.experimental import pallas as pl
from jax.experimental.pallas import tpu as pltpu


def make_sinusoidal_pe(max_len, d_model, dtype=jnp.float32):
    """Matches the torch buffer exactly (the module really uses log(100.0), not log(10000.0))."""
    position = jnp.arange(max_len, dtype=jnp.float32)[:, None]                 # (L, 1)
    div_term = jnp.exp(jnp.arange(0, d_model, 2, dtype=jnp.float32)
                       * (-math.log(100.0) / d_model))                         # (D//2,)
    ang = position * div_term                                                  # (L, D//2)
    pe = jnp.zeros((max_len, d_model), dtype=jnp.float32)
    pe = pe.at[:, 0::2].set(jnp.sin(ang))
    pe = pe.at[:, 1::2].set(jnp.cos(ang))
    return pe.astype(dtype)


def _i32(c):
    """Python int (possibly >= 2**31) -> equivalent signed int32 constant."""
    c &= 0xFFFFFFFF
    return c - (1 << 32) if c >= (1 << 31) else c


def _lsr(x, n):
    """Logical right shift of an int32 array (arithmetic shift + mask of sign bits)."""
    return (x >> n) & jnp.int32((1 << (32 - n)) - 1)


def _mix32(x):
    """Robert Jenkins' 32-bit '6-shift' integer hash.  Multiply-free, so it maps onto
    plain VPU add/xor/shift ops on v5e/v6e/v7x and also runs in interpret mode."""
    x = (x + jnp.int32(0x7ED55D16)) + (x << 12)
    x = (x ^ jnp.int32(_i32(0xC761C23C))) ^ _lsr(x, 19)
    x = (x + jnp.int32(0x165667B1)) + (x << 5)
    x = (x + jnp.int32(_i32(0xD3A2646C))) ^ (x << 9)
    x = (x + jnp.int32(_i32(0xFD7046C5))) + (x << 3)
    x = (x ^ jnp.int32(_i32(0xB55A4F09))) ^ _lsr(x, 16)
    return x


def _pos_enc_kernel(seed_ref, x_ref, pe_ref, o_ref, *, p_drop, train, tb, ft):
    # seed_ref: SMEM (1,) int32;  x_ref: (tb, ft);  pe_ref: (1, ft);  o_ref: (tb, ft)
    y = x_ref[...] + pe_ref[...]                       # broadcast pe over the batch rows
    if train and p_drop > 0.0:
        # Stateless inverted dropout: keep decision = hash(global element index, seed),
        # so the mask is independent of tiling / grid split and needs no HW PRNG.
        f = pl.program_id(0)                           # flat-axis block index
        b = pl.program_id(1)                           # batch-axis block index
        col = jax.lax.broadcasted_iota(jnp.int32, y.shape, 1) + f * ft
        row = jax.lax.broadcasted_iota(jnp.int32, y.shape, 0) + b * tb
        h = _mix32(col ^ seed_ref[0])
        h = _mix32(h + row)
        u31 = h & jnp.int32(0x7FFFFFFF)                # uniform in [0, 2**31)
        thresh = jnp.int32(min(int(round(p_drop * (1 << 31))), (1 << 31) - 1))
        keep = u31 >= thresh                           # P(keep) = 1 - p_drop
        scale = jnp.asarray(1.0 / (1.0 - p_drop), dtype=y.dtype)   # math stays in input dtype
        y = jnp.where(keep, y * scale, jnp.zeros_like(y))
    o_ref[...] = y.astype(o_ref.dtype)


def _choose_tiles(B, flat, itemsize, train,
                  target_block_bytes=4 * 1024 * 1024,
                  vmem_budget_bytes=24 * 1024 * 1024):
    """Pick (tb, ft): batch rows and flat-axis width per block.

    Targets ~4 MiB x-blocks (HBM-roofline plateau; also guarantees many grid steps
    for large tensors -> pipelining + 2-TC load-balance on v7x) while keeping the
    honest working set (double-buffered x+out, pe block, hash temporaries) within a
    VMEM budget that is safe on every generation."""
    # Second-to-last block dim must be a multiple of 8 or the full batch dim.
    tb_cands = sorted({d for d in range(1, B + 1) if B % d == 0 and (d == B or d % 8 == 0)})
    # Last block dim must be a multiple of 128 or the full flat dim.
    if flat % 128 == 0:
        ft_cands = sorted({d for d in range(128, flat + 1, 128) if flat % d == 0}) or [flat]
    else:
        ft_cands = [flat]

    def working(tb, ft):
        xout = 2 * 2 * tb * ft * itemsize        # double-buffered x + out blocks
        pe_b = 2 * ft * itemsize                 # double-buffered pe block
        tmp = 2 * tb * ft * 4 if train else 0    # int32 hash temporaries (rough)
        return xout + pe_b + tmp

    combos = [(tb, ft) for tb in tb_cands for ft in ft_cands]
    feasible = [c for c in combos if working(*c) <= vmem_budget_bytes]
    pool = feasible if feasible else combos
    small_enough = [c for c in pool if c[0] * c[1] * itemsize <= target_block_bytes]
    if small_enough:
        tb, ft = max(small_enough, key=lambda c: (c[0] * c[1], c[1]))
    else:
        tb, ft = min(pool, key=lambda c: (c[0] * c[1], c[0]))
    return tb, ft


def positional_encoding_fwd(x, pe, *, p_drop=0.1, train=False, seed=0,
                            force_kernel=False, tiles=None):
    """x: (B, S, D); pe: (max_len, D) with max_len >= S.  Forward of the torch module."""
    if not (0.0 <= p_drop < 1.0):
        raise ValueError(f"p_drop must be in [0, 1), got {p_drop}")
    B, S, D = x.shape
    pe_s = pe[:S].astype(x.dtype)                      # forward slices pe[:, :x.size(1)]

    # Eval mode / p=0 is a plain broadcast add that XLA fuses optimally; the kernel is
    # reserved for the fused-dropout training path unless explicitly forced.
    if (not train or p_drop == 0.0) and not force_kernel:
        return x + pe_s[None]

    flat = S * D
    x2 = x.reshape(B, flat)                            # lane-dense last dim even for D < 128
    pe2 = pe_s.reshape(1, flat)

    if tiles is None:
        tb, ft = _choose_tiles(B, flat, x.dtype.itemsize, train and p_drop > 0.0)
    else:
        tb, ft = tiles
    assert B % tb == 0 and flat % ft == 0, (tb, ft, B, flat)

    seed_arr = jnp.asarray([seed], dtype=jnp.int32)
    kernel = functools.partial(_pos_enc_kernel, p_drop=float(p_drop),
                               train=bool(train), tb=int(tb), ft=int(ft))
    out = pl.pallas_call(
        kernel,
        out_shape=jax.ShapeDtypeStruct((B, flat), x.dtype),
        grid_spec=pltpu.PrefetchScalarGridSpec(
            num_scalar_prefetch=1,                     # dropout seed -> SMEM
            grid=(flat // ft, B // tb),                # flat axis outer: each pe block re-read once
            in_specs=[
                pl.BlockSpec((tb, ft), lambda f, b, seed: (b, f)),   # x
                pl.BlockSpec((1, ft), lambda f, b, seed: (0, f)),    # pe (resident when nf == 1)
            ],
            out_specs=pl.BlockSpec((tb, ft), lambda f, b, seed: (b, f)),
        ),
        compiler_params=pltpu.CompilerParams(
            dimension_semantics=("parallel", "parallel"),
            vmem_limit_bytes=48 * 1024 * 1024,
        ),
    )(seed_arr, x2, pe2)
    return out.reshape(B, S, D)


def positional_encoding_ref(x, pe):
    """Pure-JAX eval-mode reference (dropout = identity)."""
    S = x.shape[1]
    return x + pe[None, :S, :].astype(x.dtype)


if __name__ == "__main__":
    # Small shapes consistent with the module: (batch, seq, d_model).
    B, S, D = 4, 16, 128
    MAX_LEN = 64
    P_DROP = 0.1

    key = jax.random.PRNGKey(0)
    x = jax.random.normal(key, (B, S, D), dtype=jnp.float32)
    pe = make_sinusoidal_pe(MAX_LEN, D)
    ref = positional_encoding_ref(x, pe)

    # Eval mode through the kernel (dropout = identity): exact match vs reference.
    out = jax.block_until_ready(
        positional_encoding_fwd(x, pe, p_drop=P_DROP, train=False, force_kernel=True))
    assert out.shape == (B, S, D)
    assert jnp.allclose(out, ref, atol=1e-6, rtol=1e-6), "eval-mode (kernel) mismatch"

    # Eval-mode short-circuit (pure JAX path) agrees too.
    out_sc = jax.block_until_ready(positional_encoding_fwd(x, pe, p_drop=P_DROP, train=False))
    assert jnp.allclose(out_sc, ref, atol=1e-6, rtol=1e-6), "eval-mode (short-circuit) mismatch"

    # Training mode: fused stateless inverted dropout.  Every element is either 0 or
    # (x + pe) / (1 - p), and the drop rate is plausible.
    out_tr = jax.block_until_ready(
        positional_encoding_fwd(x, pe, p_drop=P_DROP, train=True, seed=1234))
    assert out_tr.shape == (B, S, D)
    assert bool(jnp.all(jnp.isfinite(out_tr)))
    scale = 1.0 / (1.0 - P_DROP)
    nz = out_tr != 0.0
    assert bool(jnp.allclose(jnp.where(nz, out_tr, 0.0),
                             jnp.where(nz, ref * scale, 0.0),
                             atol=1e-5, rtol=1e-5)), \
        "training-mode kept values do not match (x + pe) / (1 - p)"
    zero_frac = float(jnp.mean((~nz).astype(jnp.float32)))
    assert 0.01 < zero_frac < 0.35, f"implausible dropout zero fraction {zero_frac}"

    # Mask is a function of the global element index + seed, so a different tiling
    # produces bit-identical output.
    out_tr2 = jax.block_until_ready(
        positional_encoding_fwd(x, pe, p_drop=P_DROP, train=True, seed=1234, tiles=(4, 512)))
    assert bool(jnp.array_equal(out_tr, out_tr2)), "dropout mask depends on tiling"

    # D < 128 path: wrapper flattens (S, D) so the last dim stays lane-dense.
    B2, S2, D2 = 2, 8, 64
    x_small = jax.random.normal(jax.random.PRNGKey(1), (B2, S2, D2), dtype=jnp.float32)
    pe_small = make_sinusoidal_pe(32, D2)
    out_small = jax.block_until_ready(
        positional_encoding_fwd(x_small, pe_small, p_drop=P_DROP, train=False, force_kernel=True))
    assert jnp.allclose(out_small, positional_encoding_ref(x_small, pe_small),
                        atol=1e-6, rtol=1e-6), "D<128 flattened path mismatch"

    print("KERNEL_OK")
</pallas_src>

<mosaic_0001>
module attributes {stable_mosaic.version = 11 : i64} {
  func.func @_pos_enc_kernel(%arg0: i32, %arg1: i32, %arg2: memref<1xi32, #tpu.memory_space<smem>>, %arg3: memref<4x2048xf32, #tpu.memory_space<vmem>>, %arg4: memref<1x2048xf32, #tpu.memory_space<vmem>>, %arg5: memref<4x2048xf32, #tpu.memory_space<vmem>>) attributes {dimension_semantics = [#tpu.dimension_semantics<parallel>, #tpu.dimension_semantics<parallel>], iteration_bounds = array<i64: 1, 1>, scalar_prefetch = 1 : i64, scratch_operands = 0 : i64, tpu.core_type = #tpu.core_type<tc>, window_params = [{transform_indices = @transform_0, window_bounds = array<i64: 4, 2048>}, {transform_indices = @transform_1, window_bounds = array<i64: 1, 2048>}, {transform_indices = @transform_2, window_bounds = array<i64: 4, 2048>}]} {
    %c0 = arith.constant 0 : index
    %c0_0 = arith.constant 0 : index
    %0 = vector.load %arg3[%c0, %c0_0] : memref<4x2048xf32, #tpu.memory_space<vmem>>, vector<4x2048xf32>
    %c0_1 = arith.constant 0 : index
    %c0_2 = arith.constant 0 : index
    %1 = vector.load %arg4[%c0_1, %c0_2] : memref<1x2048xf32, #tpu.memory_space<vmem>>, vector<1x2048xf32>
    %2 = vector.broadcast %1 : vector<1x2048xf32> to vector<4x2048xf32>
    %3 = arith.addf %0, %2 : vector<4x2048xf32>
    %c0_3 = arith.constant 0 : index
    %c0_4 = arith.constant 0 : index
    %4 = vector.load %arg5[%c0_3, %c0_4] : memref<4x2048xf32, #tpu.memory_space<vmem>>, vector<4x2048xf32>
    tpu.vector_store %arg5[%c0_3, %c0_4], %3 {strides = array<i32>} : memref<4x2048xf32, #tpu.memory_space<vmem>>, vector<4x2048xf32>,
    return
  }
  func.func @transform_0(%arg0: i32, %arg1: i32, %arg2: memref<1xi32, #tpu.memory_space<smem>>) -> (i32, i32) {
    %c0_i32 = arith.constant 0 : i32
    return %arg1, %arg0 : i32, i32
  }
  func.func @transform_1(%arg0: i32, %arg1: i32, %arg2: memref<1xi32, #tpu.memory_space<smem>>) -> (i32, i32) {
    %c0_i32 = arith.constant 0 : i32
    %c0_i32_0 = arith.constant 0 : i32
    return %c0_i32, %arg0 : i32, i32
  }
  func.func @transform_2(%arg0: i32, %arg1: i32, %arg2: memref<1xi32, #tpu.memory_space<smem>>) -> (i32, i32) {
    %c0_i32 = arith.constant 0 : i32
    return %arg1, %arg0 : i32, i32
  }
}

</mosaic_0001>

<bundles_post_ra>
// kernel: tpu_custom_call.1
= control target key start
LH: loop header
LB: loop body
LE: loop exit
PB: predicated region body
PF: predicated region fallthrough
CT: control target
= control target key end

     0   :  { %9 = vsyncpa [#allocation5], 0  ;;  %s250_s0 = inlined_call_operand.<no memory space> [shape: s32[1], index: 0, kind: input, shape index: {}]   ;;  %s251_s1 = inlined_call_operand.hbm [shape: f32[4,2048], index: 1, kind: input, shape index: {}]   ;;  %s252_s2 = inlined_call_operand.hbm [shape: f32[1,2048], index: 2, kind: input, shape index: {}]   ;;  %s253_s3 = inlined_call_operand.hbm [shape: f32[4,2048], index: 3, kind: output, shape index: {}]  }
   0x1   :  { %10 = vsyncpa [#allocation8], 0 }
   0x2   :  { %11 = vsyncpa [#allocation6], 0  ;;  %s17_s14 = sshll.u32 %s251_s1, 4  ;;  %s210_s15 = smov [#allocation4]   ;;  %s18_s14 = int_to_ptr.hbm [resolvable:$true] %s17_s14 }
   0x3   :  { %s19_s16 = sshll.u32 %s210_s15, 4  ;;  %s28_s18 = sshll.u32 %s252_s2, 4  ;;  %s20_s16 = int_to_ptr.vmem [resolvable:$true] %s19_s16  ;;  %s29_s18 = int_to_ptr.hbm [resolvable:$true] %s28_s18 }
   0x4   :  { %22 = dma.hbm_to_vmem [thread:$0]  %s18_s14, 1024, %s20_s16, [#allocation5]  }
   0x5   :  { %s211_s19 = smov [#allocation7]  }
   0x6   :  { %s30_s20 = sshll.u32 %s211_s19, 4  ;;  %s31_s20 = int_to_ptr.vmem [resolvable:$true] %s30_s20 }
   0x7   :  { %33 = dma.hbm_to_vmem [thread:$0]  %s29_s18, 256, %s31_s20, [#allocation8]  }
   0x8   :  { %204 = dma.done.wait [#allocation5], 1024  }
   0x9   :  { %205 = vsyncadd [#allocation5], 4294966272 }
   0xa   :  { %206 = dma.done.wait [#allocation8], 256  }
   0xb   :  { %207 = vsyncadd [#allocation8], 4294967040  ;;  %v50_v0 = vld [vmem:[#allocation7] sm:$0xff]  ;;  %vm78_vm0 = vcmask 1043456   ;;  %v51_v9 = vld [vmem:[#allocation7 + $0x8] sm:$0xff]  ;;  %s212_s1 = smov [#allocation9]  }
   0xc   :  { %v54_v1 = vperm.slane %v50_v0, 0  ;;  %v55_v2 = vperm.slane %v50_v0, 1  ;;  %v56_v3 = vperm.slane %v50_v0, 2  ;;  %v57_v4 = vperm.slane %v50_v0, 3  ;;  %v42_v10 = vld [vmem:[#allocation4] sm:$0xff]  ;;  %v43_v12 = vld [vmem:[#allocation4 + $0x8] sm:$0xff] }
   0xd   :  { %v58_v5 = vperm.slane %v50_v0, 4  ;;  %v59_v6 = vperm.slane %v50_v0, 5  ;;  %v60_v7 = vperm.slane %v50_v0, 6  ;;  %v61_v8 = vperm.slane %v50_v0, 7  ;;  %v44_v16 = vld [vmem:[#allocation4 + $0x10] sm:$0xff]  ;;  %v45_v18 = vld [vmem:[#allocation4 + $0x18] sm:$0xff] }
   0xe   :  { %v70_v11 = vrot.slane %v55_v2, 4  ;;  %v71_v13 = vrot.slane %v57_v4, 4  ;;  %v62_v14 = vperm.slane %v51_v9, 0  ;;  %v63_v15 = vperm.slane %v51_v9, 1  ;;  %v46_v24 = vld [vmem:[#allocation4 + $0x20] sm:$0xff]  ;;  %v47_v34 = vld [vmem:[#allocation4 + $0x28] sm:$0xff] }
   0xf   :  { %v72_v17 = vrot.slane %v59_v6, 4  ;;  %v73_v19 = vrot.slane %v61_v8, 4  ;;  %v64_v20 = vperm.slane %v51_v9, 2  ;;  %v65_v21 = vperm.slane %v51_v9, 3  ;;  %v48_v42 = vld [vmem:[#allocation4 + $0x30] sm:$0xff]  ;;  %v49_v44 = vld [vmem:[#allocation4 + $0x38] sm:$0xff] }
  0x10   :  { %v79_v22 = vsel %vm78_vm0, %v54_v1, %v70_v11  ;;  %v80_v23 = vsel %vm78_vm0, %v56_v3, %v71_v13  ;;  %v74_v25 = vrot.slane %v63_v15, 4  ;;  %v66_v26 = vperm.slane %v51_v9, 4  ;;  %s116_s2 = sshll.u32 %s212_s1, 4  ;;  %s118_s23 = sshll.u32 %s253_s3, 4  ;;  %s117_s2 = int_to_ptr.vmem [resolvable:$true] %s116_s2  ;;  %s119_s23 = int_to_ptr.hbm [resolvable:$true] %s118_s23 }
  0x11   :  { %v95_v27 = vadd.f32 %v79_v22, %v42_v10  ;;  %v96_v28 = vadd.f32 %v80_v23, %v43_v12  ;;  %v81_v29 = vsel %vm78_vm0, %v58_v5, %v72_v17  ;;  %v82_v30 = vsel %vm78_vm0, %v60_v7, %v73_v19 }
  0x12   :  { %v97_v31 = vadd.f32 %v81_v29, %v44_v16  ;;  %v98_v32 = vadd.f32 %v82_v30, %v45_v18  ;;  %v83_v33 = vsel %vm78_vm0, %v62_v14, %v74_v25  ;;  %v75_v35 = vrot.slane %v65_v21, 4 }
  0x13   :  { %103 = vst [vmem:[#allocation9] sm:$0xff] %v95_v27  ;;  %v99_v36 = vadd.f32 %v83_v33, %v46_v24  ;;  %v67_v37 = vperm.slane %v51_v9, 5  ;;  %v68_v38 = vperm.slane %v51_v9, 6  ;;  %v69_v39 = vperm.slane %v51_v9, 7 }
  0x14   :  { %104 = vst [vmem:[#allocation9 + $0x8] sm:$0xff] %v96_v28  ;;  %v84_v40 = vsel %vm78_vm0, %v64_v20, %v75_v35 }
  0x15   :  { %105 = vst [vmem:[#allocation9 + $0x10] sm:$0xff] %v97_v31  ;;  %v100_v41 = vadd.f32 %v84_v40, %v47_v34  ;;  %v76_v43 = vrot.slane %v67_v37, 4  ;;  %v77_v45 = vrot.slane %v69_v39, 4 }
  0x16   :  { %106 = vst [vmem:[#allocation9 + $0x18] sm:$0xff] %v98_v32 }
  0x17   :  { %107 = vst [vmem:[#allocation9 + $0x20] sm:$0xff] %v99_v36  ;;  %v85_v46 = vsel %vm78_vm0, %v66_v26, %v76_v43  ;;  %v86_v47 = vsel %vm78_vm0, %v68_v38, %v77_v45 }
  0x18   :  { %108 = vst [vmem:[#allocation9 + $0x28] sm:$0xff] %v100_v41  ;;  %v101_v48 = vadd.f32 %v85_v46, %v48_v42  ;;  %v102_v49 = vadd.f32 %v86_v47, %v49_v44 }
  0x1a   :  { %109 = vst [vmem:[#allocation9 + $0x30] sm:$0xff] %v101_v48 }
  0x1b   :  { %110 = vst [vmem:[#allocation9 + $0x38] sm:$0xff] %v102_v49 }
  0x1c   :  { %121 = dma.vmem_to_hbm [thread:$0]  %s117_s2, 1024, %s119_s23, [#allocation6]  }
  0x1d   :  { %208 = dma.done.wait [#allocation6], 1024  }
  0x1e   :  { %209 = vsyncadd [#allocation6], 4294966272 }
  0x1f   :  { %126 = vsyncpa [#allocation5], 1 }
  0x20   :  { %127 = vsyncpa [#allocation8], 1 }
  0x21   :  { %128 = vsyncpa [#allocation6], 1 }

</bundles_post_ra>
